<compile_context>
chip_gen: v6e
topology: v6e:2x2x1
jax: 0.10.0
libtpu: 0.0.40
codegen_flags: <defaults>
</compile_context>

<pallas_src>
import numpy as np
import jax
import jax.numpy as jnp
from jax.experimental import pallas as pl
from jax.experimental.pallas import tpu as pltpu

# ----------------------- problem sizes (small, synthetic) -----------------------
B        = 2            # cfg.batch_size
CIN      = 3            # RGB image
H = W    = 32           # image resolution
KS       = 8            # VAE downsampling factor (SD uses 8)
HL, WL   = H // KS, W // KS
NPP      = HL * WL               # 16 : patches per sample
CLAT     = 4                     # latent channels (SD uses 4)
PDIM     = CIN * KS * KS         # 192: flattened 8x8x3 patch (Cin-major)
DLAT     = NPP * CLAT            # 64 : flat latent per sample (patch-major, ch-minor)
SEQ      = 8            # text sequence length (synthetic)
EMB      = 32           # text-embedding width (synthetic)
T_STEPS  = 1000         # cfg.diffusion.timesteps
GUIDANCE = 7.5          # cfg.diffusion.guidance_scale
LATENT_SCALE = 0.18215

# packed per-sample vector input layout (lanes)
_OFF_EPS   = 0                    # [0:64)    diffusion noise eps
_OFF_COND  = DLAT                 # [64:96)   cond_cfg (pooled CFG text + temb)
_OFF_SCHED = DLAT + EMB           # [96:99)   sqrt(a), sqrt(1-a), sqrt(a)*(1-a)
_OFF_BU    = 128                  # [128:192) UNet bias
_VEC_W     = 192


# ------------------------------- fused Pallas kernel ----------------------------
def _sds_fused_kernel(x_ref, wvae_ref, aux_ref, wunet_ref, vec_ref,
                      loss_ref, z32_scr, zflat_scr, uin_scr):
    """Fused: VAE encode+sample, add_noise, toy UNet (CFG folded), SDS loss."""
    # --- VAE encode.  (2x-1) affine is folded into the weight/bias, so this is
    #     x @ (2W) + (b - colsum(W)).  Dense per-patch weight: M=32, K=192, N=8.
    ml = jnp.dot(x_ref[...], wvae_ref[...],
                 preferred_element_type=jnp.float32)               # [B*NPP, 8] f32
    mean32 = ml[:, 0:CLAT] + aux_ref[:, CLAT:2 * CLAT]             # [32, 4]
    logv32 = ml[:, CLAT:2 * CLAT] + aux_ref[:, 2 * CLAT:3 * CLAT]  # [32, 4]
    logv32 = jnp.clip(logv32, -30.0, 20.0)                         # diffusers clamp
    std32 = jnp.exp(0.5 * logv32)
    z32 = LATENT_SCALE * (mean32 + std32 * aux_ref[:, 0:CLAT])     # latent_dist.sample()*0.18215

    # --- relayout [NPP*B, CLAT] (rows = patch-major, sample-minor) -> [B, DLAT]
    #     flat latent: z[b, p*CLAT + c].  Static contiguous slices only.
    z32_scr[...] = z32
    for p in range(NPP):
        zflat_scr[:, p * CLAT:(p + 1) * CLAT] = z32_scr[p * B:(p + 1) * B, :]
    z = zflat_scr[...]                                             # [B, DLAT] f32

    # --- unpack consolidated per-sample vector input
    eps      = vec_ref[:, _OFF_EPS:_OFF_EPS + DLAT]                # [B, 64]
    cond     = vec_ref[:, _OFF_COND:_OFF_COND + EMB]               # [B, 32]
    sqrt_a   = vec_ref[:, _OFF_SCHED:_OFF_SCHED + 1]               # [B, 1]
    sqrt_1ma = vec_ref[:, _OFF_SCHED + 1:_OFF_SCHED + 2]
    coef     = vec_ref[:, _OFF_SCHED + 2:_OFF_SCHED + 3]           # sqrt(a)*(1-a)
    bu       = vec_ref[:, _OFF_BU:_OFF_BU + DLAT]                  # [B, 64]

    # --- scheduler.add_noise
    noised = sqrt_a * z + sqrt_1ma * eps                           # [B, DLAT]

    # --- toy UNet, both matmuls fused: eps_cfg = [noised | cond_cfg] @ [Wz; Wc] + bu
    #     (classifier-free guidance folded into cond_cfg in the wrapper; exact, all linear)
    uin_scr[:, 0:DLAT] = noised
    uin_scr[:, DLAT:DLAT + EMB] = cond
    eps_cfg = jnp.dot(uin_scr[...], wunet_ref[...],
                      preferred_element_type=jnp.float32) + bu     # [B, DLAT]

    # --- grad_z = alphas[t]**0.5 * sigmas[t] * (eps_t - eps); nan_to_num(., 0, 0, 0)
    grad = coef * (eps_cfg - eps)
    grad = jnp.where(jnp.isfinite(grad), grad, jnp.zeros_like(grad))
    # TODO(synk): torch asserts isfinite(grad_z).all(); no clean always-on in-kernel
    #             assert, so rely on the nan_to_num-style where() above.

    # --- sds_loss = (grad_z * latent_z).sum(dim=1).mean() == sum_all / (B*Hl*Wl)
    loss_ref[0] = jnp.sum(grad * z) * (1.0 / float(B * HL * WL))


# --------------------------------- wrapper --------------------------------------
def sds_fused(x_rows, w_vae, aux, w_unet, vec):
    vmem = pl.BlockSpec(memory_space=pltpu.MemorySpace.VMEM)
    smem = pl.BlockSpec(memory_space=pltpu.MemorySpace.SMEM)
    loss = pl.pallas_call(
        _sds_fused_kernel,
        in_specs=[vmem, vmem, vmem, vmem, vmem],
        out_specs=smem,                                  # scalar loss in SMEM
        out_shape=jax.ShapeDtypeStruct((1,), jnp.float32),
        scratch_shapes=[pltpu.VMEM((NPP * B, CLAT), jnp.float32),   # latent, patch rows
                        pltpu.VMEM((B, DLAT), jnp.float32),         # latent, flat
                        pltpu.VMEM((B, DLAT + EMB), jnp.float32)],  # fused UNet input
    )(x_rows, w_vae, aux, w_unet, vec)
    return loss[0]


def extract_patches_rows(x_nchw):
    # NCHW -> rows ordered (patch, sample): row = (hl*WL + wl)*B + b ; feature = (cin,kh,kw)
    x = x_nchw.reshape(B, CIN, HL, KS, WL, KS)
    x = jnp.transpose(x, (2, 4, 0, 1, 3, 5))              # [HL, WL, B, CIN, KS, KS]
    return x.reshape(NPP * B, PDIM)


def make_params():
    """Deterministic synthetic weights (no checkpoint loading)."""
    keys = jax.random.split(jax.random.PRNGKey(42), 6)
    w_vae = 0.05 * jax.random.normal(keys[0], (PDIM, 2 * CLAT), jnp.float32)  # [192, 8]
    b_vae = jnp.zeros((1, 2 * CLAT), jnp.float32)
    params = {
        # (2x-1)@W + b == x@(2W) + (b - colsum(W)) : fold the input affine here.
        "w_vae":     (2.0 * w_vae).astype(jnp.bfloat16),                      # [192, 8] bf16
        "b_vae_eff": b_vae - jnp.sum(w_vae, axis=0, keepdims=True),           # [1, 8] f32
        # toy UNet: [Wz ; Wc] stacked for the single fused matmul
        "w_unet": jnp.concatenate(
            [0.1 * jax.random.normal(keys[1], (DLAT, DLAT), jnp.float32),
             0.1 * jax.random.normal(keys[2], (EMB, DLAT), jnp.float32)], axis=0),  # [96, 64]
        "b_unet": jnp.zeros((1, DLAT), jnp.float32),
    }
    # DDPM (scaled_linear) alphas_cumprod, as in SD's scheduler
    betas = np.linspace(0.00085 ** 0.5, 0.012 ** 0.5, T_STEPS, dtype=np.float64) ** 2
    params["alphas_cumprod"] = jnp.asarray(np.cumprod(1.0 - betas), jnp.float32)
    # synthetic precomputed text embeddings: cat([uncond, cond]); per-step-constant
    # pooled CFG combination hoisted here (exact linear fold of the toy UNet CFG).
    uncond = jax.random.normal(keys[3], (1, SEQ, EMB), jnp.float32)
    cond = jax.random.normal(keys[4], (1, SEQ, EMB), jnp.float32)
    pooled_u = jnp.mean(uncond, axis=1)
    pooled_c = jnp.mean(cond, axis=1)
    params["pooled_cfg"] = pooled_u + GUIDANCE * (pooled_c - pooled_u)        # [1, EMB]
    return params


def build_kernel_inputs(x_aug, params, rng):
    """All wrapper-side glue (RNG draws, gathers, layout packing); 5 arrays out."""
    k_t, k_eps, k_vae = jax.random.split(rng, 3)

    # patch extraction + bf16 cast (one XLA transpose; layout plumbing only)
    x_rows = extract_patches_rows(x_aug).astype(jnp.bfloat16)                 # [32, 192]

    # per-patch-row aux: VAE reparam noise + effective biases (tiled to all rows)
    eps_vae = jax.random.normal(k_vae, (NPP * B, CLAT), jnp.float32)          # [32, 4]
    bias_tiled = jnp.tile(params["b_vae_eff"], (NPP * B, 1))                  # [32, 8]
    aux = jnp.concatenate([eps_vae, bias_tiled], axis=1)                      # [32, 12]

    # diffusion draw + hoisted scheduler scalars
    timestep = jax.random.randint(k_t, (B,), 50, min(950, T_STEPS) - 1)
    eps = jax.random.normal(k_eps, (B, DLAT), jnp.float32)
    a_t = params["alphas_cumprod"][timestep]                                  # [B]
    sqrt_a = jnp.sqrt(a_t)
    sqrt_1ma = jnp.sqrt(1.0 - a_t)
    coef = sqrt_a * (1.0 - a_t)                                               # sigmas = 1 - a
    sched = jnp.stack([sqrt_a, sqrt_1ma, coef], axis=1)                       # [B, 3]

    # sinusoidal timestep embedding (glue) + hoisted pooled-text CFG combination
    half = EMB // 2
    freqs = jnp.exp(-jnp.log(10000.0) * jnp.arange(half, dtype=jnp.float32) / half)
    ang = timestep.astype(jnp.float32)[:, None] * freqs[None, :]
    temb = jnp.concatenate([jnp.sin(ang), jnp.cos(ang)], axis=-1)             # [B, EMB]
    cond_cfg = params["pooled_cfg"] + temb                                    # [B, EMB]

    # consolidated per-sample vector input: [eps | cond_cfg | sched | pad | b_unet]
    pad = jnp.zeros((B, _OFF_BU - (_OFF_SCHED + 3)), jnp.float32)
    bu_tiled = jnp.tile(params["b_unet"], (B, 1))
    vec = jnp.concatenate([eps, cond_cfg, sched, pad, bu_tiled], axis=1)      # [B, 192]

    return x_rows, params["w_vae"], aux, params["w_unet"], vec


def sds_loss_forward(x_aug, params, rng):
    return sds_fused(*build_kernel_inputs(x_aug, params, rng))


# ------------------------- pure-JAX reference (same math) -----------------------
def sds_reference(x_rows, w_vae, aux, w_unet, vec):
    ml = x_rows.astype(jnp.float32) @ w_vae.astype(jnp.float32)
    mean32 = ml[:, :CLAT] + aux[:, CLAT:2 * CLAT]
    logv32 = jnp.clip(ml[:, CLAT:] + aux[:, 2 * CLAT:3 * CLAT], -30.0, 20.0)
    z32 = LATENT_SCALE * (mean32 + jnp.exp(0.5 * logv32) * aux[:, :CLAT])
    z = z32.reshape(NPP, B, CLAT).transpose(1, 0, 2).reshape(B, DLAT)
    eps = vec[:, _OFF_EPS:_OFF_EPS + DLAT]
    cond = vec[:, _OFF_COND:_OFF_COND + EMB]
    sqrt_a = vec[:, _OFF_SCHED:_OFF_SCHED + 1]
    sqrt_1ma = vec[:, _OFF_SCHED + 1:_OFF_SCHED + 2]
    coef = vec[:, _OFF_SCHED + 2:_OFF_SCHED + 3]
    bu = vec[:, _OFF_BU:_OFF_BU + DLAT]
    noised = sqrt_a * z + sqrt_1ma * eps
    eps_cfg = jnp.concatenate([noised, cond], axis=-1) @ w_unet + bu
    grad = coef * (eps_cfg - eps)
    grad = jnp.where(jnp.isfinite(grad), grad, 0.0)
    return jnp.sum(grad * z) / float(B * HL * WL)


if __name__ == "__main__":
    params = make_params()
    key = jax.random.PRNGKey(0)
    k_x, k_fwd = jax.random.split(key)
    # x_aug in [0, 1], NCHW like the PyTorch module's input
    x_aug = jax.random.uniform(k_x, (B, CIN, H, W), jnp.float32)

    loss = jax.jit(sds_loss_forward)(x_aug, params, k_fwd)
    loss = jax.block_until_ready(loss)
    assert loss.shape == () and jnp.isfinite(loss)

    # correctness check vs pure-JAX reference on the same bf16-quantized operands
    ref = sds_reference(*jax.jit(build_kernel_inputs)(x_aug, params, k_fwd))
    np.testing.assert_allclose(float(loss), float(ref), rtol=2e-2, atol=2e-2)

    print("KERNEL_OK")
</pallas_src>

<mosaic_0001>
module attributes {stable_mosaic.version = 11 : i64} {
  func.func @_sds_fused_kernel(%arg0: memref<32x192xbf16, #tpu.memory_space<vmem>>, %arg1: memref<192x8xbf16, #tpu.memory_space<vmem>>, %arg2: memref<32x12xf32, #tpu.memory_space<vmem>>, %arg3: memref<96x64xf32, #tpu.memory_space<vmem>>, %arg4: memref<2x192xf32, #tpu.memory_space<vmem>>, %arg5: memref<1xf32, #tpu.memory_space<smem>>, %arg6: memref<32x4xf32, #tpu.memory_space<vmem>>, %arg7: memref<2x64xf32, #tpu.memory_space<vmem>>, %arg8: memref<2x96xf32, #tpu.memory_space<vmem>>) attributes {dimension_semantics = [], scalar_prefetch = 0 : i64, scratch_operands = 3 : i64, tpu.core_type = #tpu.core_type<tc>} {
    %c0 = arith.constant 0 : index
    %c0_0 = arith.constant 0 : index
    %0 = vector.load %arg0[%c0, %c0_0] : memref<32x192xbf16, #tpu.memory_space<vmem>>, vector<32x192xbf16>
    %c0_1 = arith.constant 0 : index
    %c0_2 = arith.constant 0 : index
    %1 = vector.load %arg1[%c0_1, %c0_2] : memref<192x8xbf16, #tpu.memory_space<vmem>>, vector<192x8xbf16>
    %cst = arith.constant dense<0.000000e+00> : vector<32x8xf32>
    %2 = tpu.matmul %0, %1, %cst {dimension_numbers = #tpu.dot_dimension_numbers<[1], [0], [0], [1], [0, 0, 1, 1], [], []>} : vector<32x192xbf16>, vector<192x8xbf16>, vector<32x8xf32> -> vector<32x8xf32>
    %3 = vector.extract_strided_slice %2 {offsets = [0, 0], sizes = [32, 4], strides = [1, 1]} : vector<32x8xf32> to vector<32x4xf32>
    %c0_3 = arith.constant 0 : index
    %c4 = arith.constant 4 : index
    %4 = vector.load %arg2[%c0_3, %c4] : memref<32x12xf32, #tpu.memory_space<vmem>>, vector<32x4xf32>
    %5 = arith.addf %3, %4 : vector<32x4xf32>
    %6 = vector.extract_strided_slice %2 {offsets = [0, 4], sizes = [32, 4], strides = [1, 1]} : vector<32x8xf32> to vector<32x4xf32>
    %c0_4 = arith.constant 0 : index
    %c8 = arith.constant 8 : index
    %7 = vector.load %arg2[%c0_4, %c8] : memref<32x12xf32, #tpu.memory_space<vmem>>, vector<32x4xf32>
    %8 = arith.addf %6, %7 : vector<32x4xf32>
    %cst_5 = arith.constant -3.000000e+01 : f32
    %cst_6 = arith.constant 2.000000e+01 : f32
    %9 = vector.broadcast %cst_5 : f32 to vector<32x4xf32>
    %10 = arith.maximumf %9, %8 : vector<32x4xf32>
    %11 = vector.broadcast %cst_6 : f32 to vector<32x4xf32>
    %12 = arith.minimumf %11, %10 : vector<32x4xf32>
    %cst_7 = arith.constant 5.000000e-01 : f32
    %13 = vector.broadcast %cst_7 : f32 to vector<32x4xf32>
    %14 = arith.mulf %13, %12 : vector<32x4xf32>
    %15 = math.exp %14 : vector<32x4xf32>
    %c0_8 = arith.constant 0 : index
    %c0_9 = arith.constant 0 : index
    %16 = vector.load %arg2[%c0_8, %c0_9] : memref<32x12xf32, #tpu.memory_space<vmem>>, vector<32x4xf32>
    %17 = arith.mulf %15, %16 : vector<32x4xf32>
    %18 = arith.addf %5, %17 : vector<32x4xf32>
    %cst_10 = arith.constant 1.821500e-01 : f32
    %19 = vector.broadcast %cst_10 : f32 to vector<32x4xf32>
    %20 = arith.mulf %19, %18 : vector<32x4xf32>
    %c0_11 = arith.constant 0 : index
    %c0_12 = arith.constant 0 : index
    %21 = vector.load %arg6[%c0_11, %c0_12] : memref<32x4xf32, #tpu.memory_space<vmem>>, vector<32x4xf32>
    tpu.vector_store %arg6[%c0_11, %c0_12], %20 {strides = array<i32>} : memref<32x4xf32, #tpu.memory_space<vmem>>, vector<32x4xf32>,
    %c0_13 = arith.constant 0 : index
    %c0_14 = arith.constant 0 : index
    %22 = vector.load %arg6[%c0_13, %c0_14] : memref<32x4xf32, #tpu.memory_space<vmem>>, vector<2x4xf32>
    %c0_15 = arith.constant 0 : index
    %c0_16 = arith.constant 0 : index
    %23 = vector.load %arg7[%c0_15, %c0_16] : memref<2x64xf32, #tpu.memory_space<vmem>>, vector<2x4xf32>
    tpu.vector_store %arg7[%c0_15, %c0_16], %22 {strides = array<i32>} : memref<2x64xf32, #tpu.memory_space<vmem>>, vector<2x4xf32>,
    %c2 = arith.constant 2 : index
    %c0_17 = arith.constant 0 : index
    %24 = vector.load %arg6[%c2, %c0_17] : memref<32x4xf32, #tpu.memory_space<vmem>>, vector<2x4xf32>
    %c0_18 = arith.constant 0 : index
    %c4_19 = arith.constant 4 : index
    %25 = vector.load %arg7[%c0_18, %c4_19] : memref<2x64xf32, #tpu.memory_space<vmem>>, vector<2x4xf32>
    tpu.vector_store %arg7[%c0_18, %c4_19], %24 {strides = array<i32>} : memref<2x64xf32, #tpu.memory_space<vmem>>, vector<2x4xf32>,
    %c4_20 = arith.constant 4 : index
    %c0_21 = arith.constant 0 : index
    %26 = vector.load %arg6[%c4_20, %c0_21] : memref<32x4xf32, #tpu.memory_space<vmem>>, vector<2x4xf32>
    %c0_22 = arith.constant 0 : index
    %c8_23 = arith.constant 8 : index
    %27 = vector.load %arg7[%c0_22, %c8_23] : memref<2x64xf32, #tpu.memory_space<vmem>>, vector<2x4xf32>
    tpu.vector_store %arg7[%c0_22, %c8_23], %26 {strides = array<i32>} : memref<2x64xf32, #tpu.memory_space<vmem>>, vector<2x4xf32>,
    %c6 = arith.constant 6 : index
    %c0_24 = arith.constant 0 : index
    %28 = vector.load %arg6[%c6, %c0_24] : memref<32x4xf32, #tpu.memory_space<vmem>>, vector<2x4xf32>
    %c0_25 = arith.constant 0 : index
    %c12 = arith.constant 12 : index
    %29 = vector.load %arg7[%c0_25, %c12] : memref<2x64xf32, #tpu.memory_space<vmem>>, vector<2x4xf32>
    tpu.vector_store %arg7[%c0_25, %c12], %28 {strides = array<i32>} : memref<2x64xf32, #tpu.memory_space<vmem>>, vector<2x4xf32>,
    %c8_26 = arith.constant 8 : index
    %c0_27 = arith.constant 0 : index
    %30 = vector.load %arg6[%c8_26, %c0_27] : memref<32x4xf32, #tpu.memory_space<vmem>>, vector<2x4xf32>
    %c0_28 = arith.constant 0 : index
    %c16 = arith.constant 16 : index
    %31 = vector.load %arg7[%c0_28, %c16] : memref<2x64xf32, #tpu.memory_space<vmem>>, vector<2x4xf32>
    tpu.vector_store %arg7[%c0_28, %c16], %30 {strides = array<i32>} : memref<2x64xf32, #tpu.memory_space<vmem>>, vector<2x4xf32>,
    %c10 = arith.constant 10 : index
    %c0_29 = arith.constant 0 : index
    %32 = vector.load %arg6[%c10, %c0_29] : memref<32x4xf32, #tpu.memory_space<vmem>>, vector<2x4xf32>
    %c0_30 = arith.constant 0 : index
    %c20 = arith.constant 20 : index
    %33 = vector.load %arg7[%c0_30, %c20] : memref<2x64xf32, #tpu.memory_space<vmem>>, vector<2x4xf32>
    tpu.vector_store %arg7[%c0_30, %c20], %32 {strides = array<i32>} : memref<2x64xf32, #tpu.memory_space<vmem>>, vector<2x4xf32>,
    %c12_31 = arith.constant 12 : index
    %c0_32 = arith.constant 0 : index
    %34 = vector.load %arg6[%c12_31, %c0_32] : memref<32x4xf32, #tpu.memory_space<vmem>>, vector<2x4xf32>
    %c0_33 = arith.constant 0 : index
    %c24 = arith.constant 24 : index
    %35 = vector.load %arg7[%c0_33, %c24] : memref<2x64xf32, #tpu.memory_space<vmem>>, vector<2x4xf32>
    tpu.vector_store %arg7[%c0_33, %c24], %34 {strides = array<i32>} : memref<2x64xf32, #tpu.memory_space<vmem>>, vector<2x4xf32>,
    %c14 = arith.constant 14 : index
    %c0_34 = arith.constant 0 : index
    %36 = vector.load %arg6[%c14, %c0_34] : memref<32x4xf32, #tpu.memory_space<vmem>>, vector<2x4xf32>
    %c0_35 = arith.constant 0 : index
    %c28 = arith.constant 28 : index
    %37 = vector.load %arg7[%c0_35, %c28] : memref<2x64xf32, #tpu.memory_space<vmem>>, vector<2x4xf32>
    tpu.vector_store %arg7[%c0_35, %c28], %36 {strides = array<i32>} : memref<2x64xf32, #tpu.memory_space<vmem>>, vector<2x4xf32>,
    %c16_36 = arith.constant 16 : index
    %c0_37 = arith.constant 0 : index
    %38 = vector.load %arg6[%c16_36, %c0_37] : memref<32x4xf32, #tpu.memory_space<vmem>>, vector<2x4xf32>
    %c0_38 = arith.constant 0 : index
    %c32 = arith.constant 32 : index
    %39 = vector.load %arg7[%c0_38, %c32] : memref<2x64xf32, #tpu.memory_space<vmem>>, vector<2x4xf32>
    tpu.vector_store %arg7[%c0_38, %c32], %38 {strides = array<i32>} : memref<2x64xf32, #tpu.memory_space<vmem>>, vector<2x4xf32>,
    %c18 = arith.constant 18 : index
    %c0_39 = arith.constant 0 : index
    %40 = vector.load %arg6[%c18, %c0_39] : memref<32x4xf32, #tpu.memory_space<vmem>>, vector<2x4xf32>
    %c0_40 = arith.constant 0 : index
    %c36 = arith.constant 36 : index
    %41 = vector.load %arg7[%c0_40, %c36] : memref<2x64xf32, #tpu.memory_space<vmem>>, vector<2x4xf32>
    tpu.vector_store %arg7[%c0_40, %c36], %40 {strides = array<i32>} : memref<2x64xf32, #tpu.memory_space<vmem>>, vector<2x4xf32>,
    %c20_41 = arith.constant 20 : index
    %c0_42 = arith.constant 0 : index
    %42 = vector.load %arg6[%c20_41, %c0_42] : memref<32x4xf32, #tpu.memory_space<vmem>>, vector<2x4xf32>
    %c0_43 = arith.constant 0 : index
    %c40 = arith.constant 40 : index
    %43 = vector.load %arg7[%c0_43, %c40] : memref<2x64xf32, #tpu.memory_space<vmem>>, vector<2x4xf32>
    tpu.vector_store %arg7[%c0_43, %c40], %42 {strides = array<i32>} : memref<2x64xf32, #tpu.memory_space<vmem>>, vector<2x4xf32>,
    %c22 = arith.constant 22 : index
    %c0_44 = arith.constant 0 : index
    %44 = vector.load %arg6[%c22, %c0_44] : memref<32x4xf32, #tpu.memory_space<vmem>>, vector<2x4xf32>
    %c0_45 = arith.constant 0 : index
    %c44 = arith.constant 44 : index
    %45 = vector.load %arg7[%c0_45, %c44] : memref<2x64xf32, #tpu.memory_space<vmem>>, vector<2x4xf32>
    tpu.vector_store %arg7[%c0_45, %c44], %44 {strides = array<i32>} : memref<2x64xf32, #tpu.memory_space<vmem>>, vector<2x4xf32>,
    %c24_46 = arith.constant 24 : index
    %c0_47 = arith.constant 0 : index
    %46 = vector.load %arg6[%c24_46, %c0_47] : memref<32x4xf32, #tpu.memory_space<vmem>>, vector<2x4xf32>
    %c0_48 = arith.constant 0 : index
    %c48 = arith.constant 48 : index
    %47 = vector.load %arg7[%c0_48, %c48] : memref<2x64xf32, #tpu.memory_space<vmem>>, vector<2x4xf32>
    tpu.vector_store %arg7[%c0_48, %c48], %46 {strides = array<i32>} : memref<2x64xf32, #tpu.memory_space<vmem>>, vector<2x4xf32>,
    %c26 = arith.constant 26 : index
    %c0_49 = arith.constant 0 : index
    %48 = vector.load %arg6[%c26, %c0_49] : memref<32x4xf32, #tpu.memory_space<vmem>>, vector<2x4xf32>
    %c0_50 = arith.constant 0 : index
    %c52 = arith.constant 52 : index
    %49 = vector.load %arg7[%c0_50, %c52] : memref<2x64xf32, #tpu.memory_space<vmem>>, vector<2x4xf32>
    tpu.vector_store %arg7[%c0_50, %c52], %48 {strides = array<i32>} : memref<2x64xf32, #tpu.memory_space<vmem>>, vector<2x4xf32>,
    %c28_51 = arith.constant 28 : index
    %c0_52 = arith.constant 0 : index
    %50 = vector.load %arg6[%c28_51, %c0_52] : memref<32x4xf32, #tpu.memory_space<vmem>>, vector<2x4xf32>
    %c0_53 = arith.constant 0 : index
    %c56 = arith.constant 56 : index
    %51 = vector.load %arg7[%c0_53, %c56] : memref<2x64xf32, #tpu.memory_space<vmem>>, vector<2x4xf32>
    tpu.vector_store %arg7[%c0_53, %c56], %50 {strides = array<i32>} : memref<2x64xf32, #tpu.memory_space<vmem>>, vector<2x4xf32>,
    %c30 = arith.constant 30 : index
    %c0_54 = arith.constant 0 : index
    %52 = vector.load %arg6[%c30, %c0_54] : memref<32x4xf32, #tpu.memory_space<vmem>>, vector<2x4xf32>
    %c0_55 = arith.constant 0 : index
    %c60 = arith.constant 60 : index
    %53 = vector.load %arg7[%c0_55, %c60] : memref<2x64xf32, #tpu.memory_space<vmem>>, vector<2x4xf32>
    tpu.vector_store %arg7[%c0_55, %c60], %52 {strides = array<i32>} : memref<2x64xf32, #tpu.memory_space<vmem>>, vector<2x4xf32>,
    %c0_56 = arith.constant 0 : index
    %c0_57 = arith.constant 0 : index
    %54 = vector.load %arg7[%c0_56, %c0_57] : memref<2x64xf32, #tpu.memory_space<vmem>>, vector<2x64xf32>
    %c0_58 = arith.constant 0 : index
    %c0_59 = arith.constant 0 : index
    %55 = vector.load %arg4[%c0_58, %c0_59] : memref<2x192xf32, #tpu.memory_space<vmem>>, vector<2x64xf32>
    %c0_60 = arith.constant 0 : index
    %c64 = arith.constant 64 : index
    %56 = vector.load %arg4[%c0_60, %c64] : memref<2x192xf32, #tpu.memory_space<vmem>>, vector<2x32xf32>
    %c0_61 = arith.constant 0 : index
    %c96 = arith.constant 96 : index
    %57 = vector.load %arg4[%c0_61, %c96] : memref<2x192xf32, #tpu.memory_space<vmem>>, vector<2x1xf32>
    %c0_62 = arith.constant 0 : index
    %c97 = arith.constant 97 : index
    %58 = vector.load %arg4[%c0_62, %c97] : memref<2x192xf32, #tpu.memory_space<vmem>>, vector<2x1xf32>
    %c0_63 = arith.constant 0 : index
    %c98 = arith.constant 98 : index
    %59 = vector.load %arg4[%c0_63, %c98] : memref<2x192xf32, #tpu.memory_space<vmem>>, vector<2x1xf32>
    %c0_64 = arith.constant 0 : index
    %c128 = arith.constant 128 : index
    %60 = vector.load %arg4[%c0_64, %c128] : memref<2x192xf32, #tpu.memory_space<vmem>>, vector<2x64xf32>
    %61 = vector.broadcast %57 : vector<2x1xf32> to vector<2x64xf32>
    %62 = arith.mulf %61, %54 : vector<2x64xf32>
    %63 = vector.broadcast %58 : vector<2x1xf32> to vector<2x64xf32>
    %64 = arith.mulf %63, %55 : vector<2x64xf32>
    %65 = arith.addf %62, %64 : vector<2x64xf32>
    %c0_65 = arith.constant 0 : index
    %c0_66 = arith.constant 0 : index
    %66 = vector.load %arg8[%c0_65, %c0_66] : memref<2x96xf32, #tpu.memory_space<vmem>>, vector<2x64xf32>
    tpu.vector_store %arg8[%c0_65, %c0_66], %65 {strides = array<i32>} : memref<2x96xf32, #tpu.memory_space<vmem>>, vector<2x64xf32>,
    %c0_67 = arith.constant 0 : index
    %c64_68 = arith.constant 64 : index
    %67 = vector.load %arg8[%c0_67, %c64_68] : memref<2x96xf32, #tpu.memory_space<vmem>>, vector<2x32xf32>
    tpu.vector_store %arg8[%c0_67, %c64_68], %56 {strides = array<i32>} : memref<2x96xf32, #tpu.memory_space<vmem>>, vector<2x32xf32>,
    %c0_69 = arith.constant 0 : index
    %c0_70 = arith.constant 0 : index
    %68 = vector.load %arg8[%c0_69, %c0_70] : memref<2x96xf32, #tpu.memory_space<vmem>>, vector<2x96xf32>
    %c0_71 = arith.constant 0 : index
    %c0_72 = arith.constant 0 : index
    %69 = vector.load %arg3[%c0_71, %c0_72] : memref<96x64xf32, #tpu.memory_space<vmem>>, vector<96x64xf32>
    %cst_73 = arith.constant dense<0.000000e+00> : vector<2x64xf32>
    %70 = tpu.matmul %68, %69, %cst_73 {dimension_numbers = #tpu.dot_dimension_numbers<[1], [0], [0], [1], [0, 0, 1, 1], [], []>} : vector<2x96xf32>, vector<96x64xf32>, vector<2x64xf32> -> vector<2x64xf32>
    %71 = arith.addf %70, %60 : vector<2x64xf32>
    %72 = arith.subf %71, %55 : vector<2x64xf32>
    %73 = vector.broadcast %59 : vector<2x1xf32> to vector<2x64xf32>
    %74 = arith.mulf %73, %72 : vector<2x64xf32>
    %75 = tpu.weird %74 : vector<2x64xf32> -> vector<2x64xi1>
    %cst_74 = arith.constant dense<true> : vector<2x64xi1>
    %76 = arith.xori %75, %cst_74 : vector<2x64xi1>
    %cst_75 = arith.constant 0.000000e+00 : f32
    %77 = vector.broadcast %cst_75 : f32 to vector<2x64xf32>
    %78 = arith.select %76, %74, %77 : vector<2x64xi1>, vector<2x64xf32>
    %79 = arith.mulf %78, %54 : vector<2x64xf32>
    %80 = vector.shape_cast %79 : vector<2x64xf32> to vector<1x2x64xf32>
    %cst_76 = arith.constant dense<0.000000e+00> : vector<1xf32>
    %81 = vector.multi_reduction <add>, %80, %cst_76 [1, 2] : vector<1x2x64xf32> to vector<1xf32>
    %82 = vector.shape_cast %81 : vector<1xf32> to vector<1x1x1xf32>
    %83 = vector.extract %82[0, 0, 0] : f32 from vector<1x1x1xf32>
    %cst_77 = arith.constant 3.125000e-02 : f32
    %84 = arith.mulf %83, %cst_77 : f32
    %c0_78 = arith.constant 0 : index
    %85 = memref.load %arg5[%c0_78] : memref<1xf32, #tpu.memory_space<smem>>
    memref.store %84, %arg5[%c0_78] : memref<1xf32, #tpu.memory_space<smem>>
    return
  }
}

</mosaic_0001>

<bundles_post_ra>
// kernel: sds_loss_forward.1
= control target key start
LH: loop header
LB: loop body
LE: loop exit
PB: predicated region body
PF: predicated region fallthrough
CT: control target
= control target key end

     0   :  { %v682_v1 = vmov 0   ;;  %vm140_vm0 = vcmask 523264   ;;  %s683_s9 = smov 124   ;;  %s871_s0 = inlined_call_operand.vmem [shape: bf16[32,192], index: 0, kind: input, shape index: {}]   ;;  %s872_s1 = inlined_call_operand.vmem [shape: bf16[192,8], index: 1, kind: input, shape index: {}]   ;;  %s873_s2 = inlined_call_operand.vmem [shape: f32[32,12], index: 2, kind: input, shape index: {}]   ;;  %s874_s3 = inlined_call_operand.vmem [shape: f32[96,64], index: 3, kind: input, shape index: {}]   ;;  %s875_s4 = inlined_call_operand.vmem [shape: f32[2,192], index: 4, kind: input, shape index: {}]   ;;  %s876_s5 = inlined_call_operand.hbm [shape: f32[1], index: 5, kind: output, shape index: {}]  }
   0x1   :  { %v646_v0 = vld [vmem:[%s872_s1 + $0x38] sm:$0xff]   ;;  %147 = vmatprep.subr.bf16.mxu0 %v682_v1  ;;  %v647_v2 = vld [vmem:[%s872_s1 + $0x30] sm:$0xff]   ;;  %v648_v3 = vld [vmem:[%s872_s1 + $0x28] sm:$0xff]  }
   0x2   :  { %148 = vmatpush1.bf16.msra.mxu0 %v646_v0  ;;  %v649_v4 = vld [vmem:[%s872_s1 + $0x20] sm:$0xff]   ;;  %v650_v6 = vld [vmem:[%s872_s1 + $0x18] sm:$0xff]   ;;  %v198_v8 = vld [vmem:[%s873_s2 + $0x10] sm:$0xff] }
   0x3   :  { %149 = vmatprep.subr.bf16.mxu0 %v682_v1  ;;  %v660_v5 = vld [vmem:[%s871_s0 + $0x4] ss:$8 sps:$4 sm:$0xff]   ;;  %208 = vrot.lane.b32.xlu1 %v198_v8, %s683_s9 }
   0x4   :  { %v196_v7 = vld [vmem:[%s873_s2] sm:$0xff]  ;;  %572 = vmatprep.mubr.msk.bf16.mxu0 %vm140_vm0, %v660_v5 }
   0x5   :  { %204 = vrot.lane.b32.xlu0 %v196_v7, %s683_s9 }
   0x6   :  { %150 = vmatpush1.bf16.msra.mxu0 %v647_v2 }
   0x7   :  { %151 = vmatprep.subr.bf16.mxu0 %v682_v1 }
   0xa   :  { %152 = vmatpush1.bf16.msra.mxu0 %v648_v3 }
   0xb   :  { %153 = vmatprep.subr.bf16.mxu0 %v682_v1 }
   0xe   :  { %154 = vmatpush1.bf16.msra.mxu0 %v649_v4 }
   0xf   :  { %155 = vmatprep.subr.bf16.mxu0 %v682_v1 }
  0x10   :  { %10 = vsyncpa [#allocation6], 0  ;;  %v197_v9 = vld [vmem:[%s873_s2 + $0x8] sm:$0xff]  ;;  %v199_v10 = vld [vmem:[%s873_s2 + $0x18] sm:$0xff]  ;;  %s684_s18 = smov 4   ;;  %v686_v2 = vmov 97  }
  0x11   :  { %v651_v11 = vld [vmem:[%s872_s1 + $0x10] sm:$0xff]   ;;  %206 = vrot.lane.b32.xlu0 %v197_v9, %s683_s9  ;;  %210 = vrot.lane.b32.xlu1 %v199_v10, %s683_s9  ;;  %v652_v12 = vld [vmem:[%s872_s1 + $0x8] sm:$0xff]   ;;  %vm280_vm1 = vcmask 31744   ;;  %vm286_vm2 = vcmask 25600   ;;  %s690_s10 = smov 20   ;;  %s691_s11 = smov 24  }
  0x12   :  { %156 = vmatpush1.bf16.msra.mxu0 %v650_v6  ;;  %v653_v13 = vld [vmem:[%s872_s1] sm:$0xff]   ;;  %v654_v14 = vld [vmem:[%s872_s1 + $0x58] sm:$0xff]   ;;  %v655_v15 = vld [vmem:[%s872_s1 + $0x50] sm:$0xff]   ;;  %643 = vset.pattern.permute.xlu0 %v686_v2  ;;  %s692_s12 = smov 28   ;;  %s693_s13 = smov 32   ;;  %vm702_vm3 = vmmov 0  }
  0x13   :  { %157 = vmatprep.subr.bf16.mxu0 %v682_v1  ;;  %v656_v16 = vld [vmem:[%s872_s1 + $0x48] sm:$0xff]   ;;  %v657_v17 = vld [vmem:[%s872_s1 + $0x40] sm:$0xff]   ;;  %v661_v19 = vld [vmem:[%s871_s0 + $0x14] ss:$8 sps:$4 sm:$0xff]   ;;  %s688_s1 = smov 12   ;;  %s694_s16 = smov 36  }
  0x14   :  { %v658_v18 = vld [vmem:[%s871_s0] ss:$8 sps:$4 sm:$0xff]   ;;  %v663_v20 = vld [vmem:[%s871_s0 + $0x10] ss:$8 sps:$4 sm:$0xff]   ;;  %s687_s0 = smov 8   ;;  %s695_s17 = smov 40  }
  0x15   :  { %240 = vrot.lane.b32.xlu0 %v196_v7, %s684_s18  ;;  %242 = vrot.lane.b32.xlu1 %v197_v9, %s684_s18  ;;  %s697_s19 = smov 44   ;;  %s698_s20 = smov 48   ;;  %vm293_vm4 = vcmask 58400   ;;  %vm300_vm5 = vcmask 91200   ;;  %vm307_vm6 = vcmask 124000   ;;  %vm314_vm7 = vcmask 156800  }
  0x16   :  { %158 = vmatpush1.bf16.msra.mxu0 %v651_v11  ;;  %s699_s21 = smov 52   ;;  %s700_s22 = smov 56   ;;  %vm321_vm8 = vcmask 189600   ;;  %vm328_vm9 = vcmask 222400   ;;  %vm335_vm10 = vcmask 255200   ;;  %vm342_vm11 = vcmask 288000  }
  0x17   :  { %159 = vmatprep.subr.bf16.mxu0 %v682_v1  ;;  %s701_s29 = smov 60   ;;  %vm349_vm12 = vcmask 320800   ;;  %vm356_vm13 = vcmask 353600   ;;  %vm363_vm14 = vcmask 386400   ;;  %vm370_vm15 = vcmask 419200  }
  0x19   :  { %244 = vrot.lane.b32.xlu0 %v198_v8, %s684_s18  ;;  %246 = vrot.lane.b32.xlu1 %v199_v10, %s684_s18 }
  0x1a   :  { %160 = vmatpush1.bf16.msra.mxu0 %v652_v12 }
  0x1b   :  { %161 = vmatprep.subr.bf16.mxu0 %v682_v1 }
  0x1e   :  { %162 = vmatpush1.bf16.msra.mxu0 %v653_v13 }
  0x1f   :  { %171 = vmatprep.subr.bf16.mxu0 %v682_v1 }
  0x22   :  { %172 = vmatpush2.bf16.msra.mxu0 %v654_v14 }
  0x23   :  { %173 = vmatprep.subr.bf16.mxu0 %v682_v1 }
  0x26   :  { %174 = vmatpush2.bf16.msra.mxu0 %v655_v15 }
  0x27   :  { %175 = vmatprep.subr.bf16.mxu0 %v682_v1 }
  0x2a   :  { %176 = vmatpush2.bf16.msra.mxu0 %v656_v16 }
  0x2b   :  { %177 = vmatprep.subr.bf16.mxu0 %v682_v1  ;;  %v685_v1 = vmov 96  }
  0x2c   :  { %642 = vset.pattern.permute.xlu1 %v685_v1 }
  0x2e   :  { %178 = vmatpush2.bf16.msra.mxu0 %v657_v17 }
  0x31   :  { %180 = vmatmul.mubr.bf16.vlgmr.msra.gmra.mxu0 %v658_v18 }
  0x32   :  { %573 = vmatprep.mubr.msk.bf16.mxu0 %vm140_vm0, %v661_v19  ;;  %vm377_vm0 = vcmask 452000  }
  0x39   :  { %188 = vmatmul.mubr.bf16.gmra.mxu0 %v663_v20 }
  0x75   :  { %v209_v28 = vpop.permute.xlu1 %208 }
  0x77   :  { %v205_v21 = vpop.permute.xlu0 %204 }
  0x83   :  { %v207_v25 = vpop.permute.xlu0 %206  ;;  %v211_v39 = vpop.permute.xlu1 %210 }
  0x87   :  { %v241_v53 = vpop.permute.xlu0 %240  ;;  %v243_v56 = vpop.permute.xlu1 %242 }
  0x8b   :  { %v245_v59 = vpop.permute.xlu0 %244  ;;  %v247_v62 = vpop.permute.xlu1 %246 }
  0xf1   :  { %v181_v22 = vpop.f32.mrf.mxu0 }
  0xf2   :  { %v216_v23 = vadd.f32 %v205_v21, %v181_v22 }
  0xf3   :  { %v183_v24 = vpop.f32.mrf.mxu0 }
  0xf4   :  { %v220_v26 = vmax.f32 %v216_v23, -30.0 }
  0xf5   :  { %v184_v27 = vpop.f32.mrf.mxu0 }
  0xf6   :  { %v224_v29 = vmin.f32 %v220_v26, 20.0  ;;  %v217_v30 = vadd.f32 %v207_v25, %v184_v27  ;;  %v438_v26 = vld [vmem:[%s874_s3 + $0x58] sm:$0xff]  ;;  %v696_v27 = vmov 0.0  }
  0xf7   :  { %v186_v31 = vpop.f32.mrf.mxu0  ;;  %588 = vmatprep.subr.mxu1 %v696_v27  ;;  %612 = vmatprep.mubr.msk.f32.mxu1 %vm702_vm3, %v696_v27  ;;  %vm422_vm3 = vcmask 517120  }
  0xf8   :  { %v228_v32 = vmul.f32 0.5, %v224_v29  ;;  %v221_v33 = vmax.f32 %v217_v30, -30.0  ;;  %589 = vmatpush3.msra.mxu1 %v438_v26 }
  0xf9   :  { %v189_v34 = vpop.f32.mrf.mxu0  ;;  %590 = vmatprep.subr.mxu1 %v696_v27 }
  0xfa   :  { %v232_v35 = vmul.f32 1.442695, %v228_v32  ;;  %v225_v36 = vmin.f32 %v221_v33, 20.0  ;;  %v218_v37 = vadd.f32 %v209_v28, %v189_v34  ;;  %v437_v28 = vld [vmem:[%s874_s3 + $0x50] sm:$0xff]  ;;  %v436_v33 = vld [vmem:[%s874_s3 + $0x48] sm:$0xff] }
  0xfb   :  { %v191_v38 = vpop.f32.mrf.mxu0  ;;  %591 = vmatpush3.msra.mxu1 %v437_v28  ;;  %v828_v34 = vld [vmem:[%s875_s4] sm:$0x3] }
  0xfc   :  { %664 = vpow2.f32 %v232_v35  ;;  %v229_v40 = vmul.f32 0.5, %v225_v36  ;;  %v222_v41 = vmax.f32 %v218_v37, -30.0  ;;  %592 = vmatprep.subr.mxu1 %v696_v27  ;;  %v435_v35 = vld [vmem:[%s874_s3 + $0x40] sm:$0xff]  ;;  %v433_v38 = vld [vmem:[%s874_s3 + $0x30] sm:$0xff] }
  0xfd   :  { %v192_v42 = vpop.f32.mrf.mxu0  ;;  %593 = vmatpush3.msra.mxu1 %v436_v33 }
  0xfe   :  { %v234_v43 = vmul.f32 1.442695, %v229_v40  ;;  %v226_v44 = vmin.f32 %v222_v41, 20.0  ;;  %v219_v45 = vadd.f32 %v211_v39, %v192_v42  ;;  %594 = vmatprep.subr.mxu1 %v696_v27  ;;  %v432_v39 = vld [vmem:[%s874_s3 + $0x28] sm:$0xff]  ;;  %v431_v40 = vld [vmem:[%s874_s3 + $0x20] sm:$0xff]  ;;  %v430_v41 = vld [vmem:[%s874_s3 + $0x18] sm:$0xff] }
  0xff   :  { %v194_v46 = vpop.f32.mrf.mxu0  ;;  %595 = vmatpush3.msra.mxu1 %v435_v35  ;;  %v429_v42 = vld [vmem:[%s874_s3 + $0x10] sm:$0xff] }
 0x100   :  { %666 = vpow2.f32 %v234_v43  ;;  %v230_v47 = vmul.f32 0.5, %v226_v44  ;;  %v223_v48 = vmax.f32 %v219_v45, -30.0  ;;  %596 = vmatprep.subr.mxu1 %v696_v27  ;;  %v428_v43 = vld [vmem:[%s874_s3 + $0x8] sm:$0xff]  ;;  %v427_v44 = vld [vmem:[%s874_s3] sm:$0xff] }
 0x102   :  { %v236_v49 = vmul.f32 1.442695, %v230_v47  ;;  %v227_v50 = vmin.f32 %v223_v48, 20.0 }
 0x104   :  { %668 = vpow2.f32 %v236_v49  ;;  %v231_v51 = vmul.f32 0.5, %v227_v50 }
 0x106   :  { %v238_v52 = vmul.f32 1.442695, %v231_v51 }
 0x108   :  { %670 = vpow2.f32 %v238_v52 }
 0x109   :  { %v665_v54 = vpop.eup %664 }
 0x10a   :  { %v252_v55 = vmul.f32 %v665_v54, %v241_v53 }
 0x10c   :  { %260 = vrot.lane.b32.xlu0 %v252_v55, %s683_s9 }
 0x10d   :  { %v667_v57 = vpop.eup %666 }
 0x10e   :  { %v253_v58 = vmul.f32 %v667_v57, %v243_v56 }
 0x110   :  { %262 = vrot.lane.b32.xlu1 %v253_v58, %s683_s9 }
 0x111   :  { %v669_v60 = vpop.eup %668 }
 0x112   :  { %v254_v61 = vmul.f32 %v669_v60, %v245_v59 }
 0x114   :  { %264 = vrot.lane.b32.xlu0 %v254_v61, %s683_s9  ;;  %v704_v61 = vmov 269488144  }
 0x115   :  { %v671_v63 = vpop.eup %670 }
 0x116   :  { %v255_v0 = vmul.f32 %v671_v63, %v247_v62  ;;  %v402_v62 = vunpack.c.l.s4 %v704_v61  ;;  %v404_v63 = vlaneseq }
 0x118   :  { %266 = vrot.lane.b32.xlu1 %v255_v0, %s683_s9  ;;  %s689_s9 = smov 16   ;;  %v403_v0 = vunpack.c.0.s8 %v402_v62  ;;  %v405_v1 = vshrl.u32 %v404_v63, 7 }
 0x11a   :  { %v406_v2 = vsub.s32 %v403_v0, %v405_v1 }
 0x17e   :  { %v261_v3 = vpop.permute.xlu0 %260 }
 0x17f   :  { %v272_v4 = vadd.f32 %v261_v3, %v216_v23 }
 0x181   :  { %v276_v5 = vmul.f32 0.18215, %v272_v4 }
 0x182   :  { %v263_v6 = vpop.permute.xlu1 %262 }
 0x183   :  { %281 = vst.msk [vmem:[#allocation2] sm:$0xff] %vm280_vm1, %v276_v5  ;;  %v273_v7 = vadd.f32 %v263_v6, %v217_v30 }
 0x185   :  { %v277_v8 = vmul.f32 0.18215, %v273_v7 }
 0x186   :  { %v265_v9 = vpop.permute.xlu0 %264 }
 0x187   :  { %282 = vst.msk [vmem:[#allocation2 + $0x8] sm:$0xff] %vm280_vm1, %v277_v8  ;;  %v274_v10 = vadd.f32 %v265_v9, %v218_v37  ;;  %v434_v37 = vld [vmem:[%s874_s3 + $0x38] sm:$0xff] }
 0x188   :  { %597 = vmatpush3.msra.mxu1 %v434_v37 }
 0x189   :  { %v278_v11 = vmul.f32 0.18215, %v274_v10  ;;  %598 = vmatprep.subr.mxu1 %v696_v27 }
 0x18a   :  { %v267_v12 = vpop.permute.xlu1 %266  ;;  %v288_v13 = vld [vmem:[#allocation2 + $0x2] sm:$0x3]  ;;  %v295_v14 = vld [vmem:[#allocation2 + $0x4] sm:$0x3]  ;;  %v285_v16 = vld [vmem:[#allocation2] sm:$0x3]  ;;  %599 = vmatpush3.msra.mxu1 %v433_v38 }
 0x18b   :  { %283 = vst.msk [vmem:[#allocation2 + $0x10] sm:$0xff] %vm280_vm1, %v278_v11  ;;  %v275_v15 = vadd.f32 %v267_v12, %v219_v45  ;;  %290 = vrot.lane.b32.xlu0 %v288_v13, %s684_s18  ;;  %297 = vrot.lane.b32.xlu1 %v295_v14, %s687_s0  ;;  %v302_v18 = vld [vmem:[#allocation2 + $0x6] sm:$0x3]  ;;  %v703_v45 = vmov 98   ;;  %v395_v12 = vld [vmem:[%s875_s4 + $0x2] sm:$0x3] }
 0x18c   :  { %287 = vst.msk [vmem:[#allocation3] sm:$0x3] %vm286_vm2, %v285_v16  ;;  %600 = vmatprep.subr.mxu1 %v696_v27  ;;  %vm391_vm2 = vcmask 517600  }
 0x18d   :  { %v279_v17 = vmul.f32 0.18215, %v275_v15  ;;  %601 = vmatpush3.msra.mxu1 %v432_v39 }
 0x18e   :  { %v309_v19 = vld [vmem:[#allocation2 + $0x8] sm:$0x3]  ;;  %v316_v20 = vld [vmem:[#allocation2 + $0xa] sm:$0x3]  ;;  %v323_v21 = vld [vmem:[#allocation2 + $0xc] sm:$0x3]  ;;  %602 = vmatprep.subr.mxu1 %v696_v27 }
 0x18f   :  { %284 = vst.msk [vmem:[#allocation2 + $0x18] sm:$0xff] %vm280_vm1, %v279_v17  ;;  %304 = vrot.lane.b32.xlu0 %v302_v18, %s688_s1  ;;  %311 = vrot.lane.b32.xlu1 %v309_v19, %s689_s9  ;;  %v330_v22 = vld [vmem:[#allocation2 + $0xe] sm:$0x3]  ;;  %vm384_vm1 = vcmask 484800  }
 0x190   :  { %603 = vmatpush3.msra.mxu1 %v431_v40 }
 0x191   :  { %604 = vmatprep.subr.mxu1 %v696_v27 }
 0x192   :  { %v337_v23 = vld [vmem:[#allocation2 + $0x10] sm:$0x3]  ;;  %v344_v24 = vld [vmem:[#allocation2 + $0x12] sm:$0x3]  ;;  %v351_v25 = vld [vmem:[#allocation2 + $0x14] sm:$0x3]  ;;  %605 = vmatpush3.msra.mxu1 %v430_v41 }
 0x193   :  { %318 = vrot.lane.b32.xlu0 %v316_v20, %s690_s10  ;;  %325 = vrot.lane.b32.xlu1 %v323_v21, %s691_s11  ;;  %v358_v29 = vld [vmem:[#allocation2 + $0x16] sm:$0x3] }
 0x194   :  { %606 = vmatprep.subr.mxu1 %v696_v27 }
 0x195   :  { %607 = vmatpush3.msra.mxu1 %v429_v42 }
 0x196   :  { %v365_v30 = vld [vmem:[#allocation2 + $0x18] sm:$0x3]  ;;  %v372_v31 = vld [vmem:[#allocation2 + $0x1a] sm:$0x3]  ;;  %v379_v32 = vld [vmem:[#allocation2 + $0x1c] sm:$0x3]  ;;  %608 = vmatprep.subr.mxu1 %v696_v27 }
 0x197   :  { %332 = vrot.lane.b32.xlu0 %v330_v22, %s692_s12  ;;  %339 = vrot.lane.b32.xlu1 %v337_v23, %s693_s13  ;;  %v386_v36 = vld [vmem:[#allocation2 + $0x1e] sm:$0x3] }
 0x198   :  { %609 = vmatpush3.msra.mxu1 %v428_v43 }
 0x199   :  { %610 = vmatprep.subr.mxu1 %v696_v27 }
 0x19a   :  { %611 = vmatpush3.msra.mxu1 %v427_v44 }
 0x19b   :  { %346 = vrot.lane.b32.xlu0 %v344_v24, %s694_s16  ;;  %353 = vrot.lane.b32.xlu1 %v351_v25, %s695_s17 }
 0x19f   :  { %360 = vrot.lane.b32.xlu0 %v358_v29, %s697_s19  ;;  %367 = vrot.lane.b32.xlu1 %v365_v30, %s698_s20  ;;  %s706_s20 = smov [#allocation5]  }
 0x1a3   :  { %374 = vrot.lane.b32.xlu0 %v372_v31, %s699_s21  ;;  %381 = vrot.lane.b32.xlu1 %v379_v32, %s700_s22 }
 0x1a7   :  { %388 = vrot.lane.b32.xlu0 %v386_v36, %s701_s29  ;;  %398 = vperm.xlu1 %642, %v828_v34  }
 0x1ab   :  { %410 = vperm.xlu0 %643, %v828_v34   ;;  %644 = vset.pattern.permute.xlu1 %v703_v45 }
 0x1ac   :  { %515 = vperm.xlu1 %644, %v828_v34  }
 0x1af   :  { %645 = vset.pattern.permute.xlu0 %v703_v45 }
 0x1fd   :  { %v291_v46 = vpop.permute.xlu0 %290  ;;  %v298_v47 = vpop.permute.xlu1 %297 }
 0x1fe   :  { %294 = vst.msk [vmem:[#allocation3] sm:$0x3] %vm293_vm4, %v291_v46  ;;  %vm424_vm4 = vcmask 779776  }
 0x1ff   :  { %301 = vst.msk [vmem:[#allocation3] sm:$0x3] %vm300_vm5, %v298_v47  ;;  %vm439_vm5 = vcmask 785408  }
 0x201   :  { %v305_v48 = vpop.permute.xlu0 %304  ;;  %v312_v49 = vpop.permute.xlu1 %311 }
 0x202   :  { %308 = vst.msk [vmem:[#allocation3] sm:$0x3] %vm307_vm6, %v305_v48 }
 0x203   :  { %315 = vst.msk [vmem:[#allocation3] sm:$0x3] %vm314_vm7, %v312_v49  ;;  %vm705_vm7 = vmmov 1  }
 0x205   :  { %v319_v50 = vpop.permute.xlu0 %318  ;;  %v326_v51 = vpop.permute.xlu1 %325 }
 0x206   :  { %322 = vst.msk [vmem:[#allocation3] sm:$0x3] %vm321_vm8, %v319_v50 }
 0x207   :  { %329 = vst.msk [vmem:[#allocation3] sm:$0x3] %vm328_vm9, %v326_v51 }
 0x209   :  { %v333_v52 = vpop.permute.xlu0 %332  ;;  %v340_v53 = vpop.permute.xlu1 %339 }
 0x20a   :  { %336 = vst.msk [vmem:[#allocation3] sm:$0x3] %vm335_vm10, %v333_v52 }
 0x20b   :  { %343 = vst.msk [vmem:[#allocation3] sm:$0x3] %vm342_vm11, %v340_v53 }
 0x20d   :  { %v347_v54 = vpop.permute.xlu0 %346  ;;  %v354_v55 = vpop.permute.xlu1 %353 }
 0x20e   :  { %350 = vst.msk [vmem:[#allocation3] sm:$0x3] %vm349_vm12, %v347_v54 }
 0x20f   :  { %357 = vst.msk [vmem:[#allocation3] sm:$0x3] %vm356_vm13, %v354_v55 }
 0x211   :  { %v361_v56 = vpop.permute.xlu0 %360  ;;  %v368_v57 = vpop.permute.xlu1 %367 }
 0x212   :  { %364 = vst.msk [vmem:[#allocation3] sm:$0x3] %vm363_vm14, %v361_v56 }
 0x213   :  { %371 = vst.msk [vmem:[#allocation3] sm:$0x3] %vm370_vm15, %v368_v57 }
 0x215   :  { %v375_v58 = vpop.permute.xlu0 %374  ;;  %v382_v59 = vpop.permute.xlu1 %381 }
 0x216   :  { %378 = vst.msk [vmem:[#allocation3] sm:$0x3] %vm377_vm0, %v375_v58 }
 0x217   :  { %385 = vst.msk [vmem:[#allocation3] sm:$0x3] %vm384_vm1, %v382_v59 }
 0x219   :  { %v389_v60 = vpop.permute.xlu0 %388 }
 0x21a   :  { %392 = vst.msk [vmem:[#allocation3] sm:$0x3] %vm391_vm2, %v389_v60 }
 0x221   :  { %v393_v7 = vld [vmem:[#allocation3] sm:$0x3] }
 0x222   :  { %v399_v3 = vpop.permute.xlu1 %398 }
 0x223   :  { %v407_v4 = vrot.slane %v399_v3, %v406_v2 }
 0x225   :  { %v408_v8 = vmul.f32 %v407_v4, %v393_v7 }
 0x226   :  { %v411_v5 = vpop.permute.xlu0 %410 }
 0x227   :  { %v419_v6 = vrot.slane %v411_v5, %v406_v2  ;;  %v516_v13 = vpop.permute.xlu1 %515 }
 0x228   :  { %v524_v16 = vrot.slane %v516_v13, %v406_v2 }
 0x229   :  { %v420_v9 = vmul.f32 %v419_v6, %v828_v34 }
 0x22b   :  { %v421_v10 = vadd.f32 %v420_v9, %v408_v8 }
 0x22d   :  { %423 = vst.msk [vmem:[#allocation4] sm:$0x3] %vm422_vm3, %v421_v10 }
 0x22e   :  { %425 = vst.msk [vmem:[#allocation4] sm:$0x3] %vm424_vm4, %v828_v34 }
 0x235   :  { %v426_v11 = vld [vmem:[#allocation4] sm:$0x3] }
 0x236   :  { %613 = vmatmul.mubr.msk.f32.vlgmr.msra.gmra.mxu1 %vm439_vm5, %v426_v11 }
 0x2f6   :  { %v509_v14 = vpop.f32.mrf.mxu1 }
 0x2f7   :  { %v510_v15 = vadd.f32 %v509_v14, %v395_v12 }
 0x2f8   :  { %v614_v17 = vpop.f32.mrf.mxu1 }
 0x2f9   :  { %v513_v18 = vsub.f32 %v510_v15, %v828_v34 }
 0x2fb   :  { %v525_v19 = vmul.f32 %v524_v16, %v513_v18 }
 0x2fd   :  { %vm526_vm6 = vweird.f32 %v525_v19 }
 0x2fe   :  { %vm527_vm8 = vmxor %vm526_vm6, %vm705_vm7 }
 0x2ff   :  { %v528_v20 = vsel %vm527_vm8, %v525_v19, 0.0 }
 0x300   :  { %v529_v21 = vmul.f32 %v528_v20, %v393_v7 }
 0x302   :  { %v530_v22 = vsel %vm422_vm3, %v529_v21, 0.0 }
 0x303   :  { %531 = vadd.xlane.f32.xlu1 %v530_v22 }
 0x38c   :  { %v532_v23 = vpop.xlane.xlu1 %531 }
 0x38d   :  { %v533_v24 = vrot.slane %v532_v23, 4 }
 0x38f   :  { %v534_v25 = vadd.f32 %v533_v24, %v532_v23 }
 0x391   :  { %v535_v26 = vrot.slane %v534_v25, 2 }
 0x393   :  { %v536_v27 = vadd.f32 %v535_v26, %v534_v25 }
 0x395   :  { %v537_v28 = vrot.slane %v536_v27, 1 }
 0x397   :  { %v538_v29 = vadd.f32 %v537_v28, %v536_v27 }
 0x399   :  { %615 = vpush %v538_v29 }
 0x3ca   :  { %s616_s4 = spop %615 }
 0x3cb   :  { %s540_s19 = smul.f32 0.03125, %s616_s4 }
 0x3cd   :  { %542 = sst [smem:[#allocation5]] %s540_s19 }
 0x3ce   :  { %550 = dma.smem_to_hbm %s706_s20, 16, %s876_s5, [#allocation6]  }
 0x3cf   :  { %680 = dma.done.wait [#allocation6], 16  }
 0x3d0   :  { %681 = vsyncadd [#allocation6], 4294967280 }
 0x3d1   :  { %554 = sfence }
 0x3d2   :  { %555 = vsyncpa [#allocation6], 1 }

</bundles_post_ra>
